<compile_context>
chip_gen: v6e
topology: v6e:2x2x1
jax: 0.10.0
libtpu: 0.0.40
codegen_flags: <defaults>
</compile_context>

<pallas_src>
import jax
import jax.numpy as jnp
from jax.experimental import pallas as pl
from jax.experimental.pallas import tpu as pltpu


IN_FEATURES = 784
HIDDEN = 128
OUT_FEATURES = 10

IN_PAD = 896      # 7 * 128 lane-dense input features (zero-padded)
OUT_PAD = 128     # lane-dense output width (zero-padded, sliced in wrapper)
TB_DEFAULT = 512  # batch rows per grid step (multiple of 16 for bf16 packing)


def _round_up(n, m):
    return (n + m - 1) // m * m


def _mlp_kernel(x_ref, w1_ref, b1_ref, w2_ref, b2_ref, o_ref):
    # fc1: (TB, 896)bf16 @ (896, 128)bf16 -> f32 on the MXU, + bias, ReLU (VPU)
    h = jnp.dot(x_ref[...], w1_ref[...], preferred_element_type=jnp.float32)
    h = jnp.maximum(h + b1_ref[...], 0.0)
    # fc2: cast hidden to bf16 (MXU-native), accumulate in f32
    out = jnp.dot(h.astype(jnp.bfloat16), w2_ref[...],
                  preferred_element_type=jnp.float32)
    o_ref[...] = (out + b2_ref[...]).astype(o_ref.dtype)


def fastthinknet_forward(x, w1, b1, w2, b2, *, tb=TB_DEFAULT):
    """Forward pass of FastThinkNet.

    x : any shape whose trailing dims flatten to 784 (e.g. (B, 1, 28, 28))
    w1: (784, 128), b1: (128,), w2: (128, 10), b2: (10,)
    returns (B, 10) float32 logits
    """
    x2d = x.reshape(-1, IN_FEATURES)                     # glue: x.view(-1, 784)
    batch = x2d.shape[0]

    # Batch tile: multiple of 16 (bf16 sublane packing), capped at TB_DEFAULT.
    tb = min(tb, _round_up(batch, 16))
    b_pad = _round_up(batch, tb)                         # all grid tiles full

    # Zero-padded, bf16 operands (padded rows/cols contribute exact zeros).
    x_p = jnp.zeros((b_pad, IN_PAD), jnp.bfloat16)
    x_p = x_p.at[:batch, :IN_FEATURES].set(x2d.astype(jnp.bfloat16))
    w1_p = jnp.zeros((IN_PAD, HIDDEN), jnp.bfloat16)
    w1_p = w1_p.at[:IN_FEATURES, :].set(w1.astype(jnp.bfloat16))
    b1_p = b1.reshape(1, HIDDEN).astype(jnp.float32)
    w2_p = jnp.zeros((HIDDEN, OUT_PAD), jnp.bfloat16)
    w2_p = w2_p.at[:, :OUT_FEATURES].set(w2.astype(jnp.bfloat16))
    b2_p = jnp.zeros((1, OUT_PAD), jnp.float32)
    b2_p = b2_p.at[:, :OUT_FEATURES].set(b2.astype(jnp.float32))

    grid = (b_pad // tb,)

    out = pl.pallas_call(
        _mlp_kernel,
        out_shape=jax.ShapeDtypeStruct((b_pad, OUT_PAD), jnp.float32),
        grid=grid,
        in_specs=[
            pl.BlockSpec((tb, IN_PAD), lambda i: (i, 0)),        # x: batch-tiled
            pl.BlockSpec((IN_PAD, HIDDEN), lambda i: (0, 0)),    # w1: resident
            pl.BlockSpec((1, HIDDEN), lambda i: (0, 0)),         # b1: resident
            pl.BlockSpec((HIDDEN, OUT_PAD), lambda i: (0, 0)),   # w2: resident
            pl.BlockSpec((1, OUT_PAD), lambda i: (0, 0)),        # b2: resident
        ],
        out_specs=pl.BlockSpec((tb, OUT_PAD), lambda i: (i, 0)),
        compiler_params=pltpu.CompilerParams(
            dimension_semantics=("parallel",),   # megacore batch sharding (v7x)
            vmem_limit_bytes=32 << 20,
        ),
    )(x_p, w1_p, b1_p, w2_p, b2_p)

    return out[:batch, :OUT_FEATURES]


def _init_params(key):
    # Deterministic synthetic init (matches nn.Linear shapes; Kaiming-uniform-ish).
    k1, k2, k3, k4 = jax.random.split(key, 4)
    bound1 = 1.0 / (IN_FEATURES ** 0.5)
    bound2 = 1.0 / (HIDDEN ** 0.5)
    w1 = jax.random.uniform(k1, (IN_FEATURES, HIDDEN), jnp.float32, -bound1, bound1)
    b1 = jax.random.uniform(k2, (HIDDEN,), jnp.float32, -bound1, bound1)
    w2 = jax.random.uniform(k3, (HIDDEN, OUT_FEATURES), jnp.float32, -bound2, bound2)
    b2 = jax.random.uniform(k4, (OUT_FEATURES,), jnp.float32, -bound2, bound2)
    return w1, b1, w2, b2


if __name__ == "__main__":
    key = jax.random.PRNGKey(0)
    kx, kp = jax.random.split(key)

    # Small MNIST-like input: batch=2, NCHW (2, 1, 28, 28) -> flattens to (2, 784).
    x = jax.random.normal(kx, (2, 1, 28, 28), dtype=jnp.float32)
    w1, b1, w2, b2 = _init_params(kp)

    out = fastthinknet_forward(x, w1, b1, w2, b2)
    out = jax.block_until_ready(out)

    # Pure-JAX reference mirroring the kernel's bf16 casts (f32 accumulation).
    x2d = x.reshape(-1, IN_FEATURES).astype(jnp.bfloat16).astype(jnp.float32)
    w1f = w1.astype(jnp.bfloat16).astype(jnp.float32)
    w2f = w2.astype(jnp.bfloat16).astype(jnp.float32)
    h = jnp.maximum(x2d @ w1f + b1, 0.0).astype(jnp.bfloat16).astype(jnp.float32)
    ref = h @ w2f + b2

    assert out.shape == (2, OUT_FEATURES)
    assert jnp.allclose(out, ref, atol=2e-2, rtol=2e-2)

    print("KERNEL_OK")
</pallas_src>

<mosaic_0001>
module attributes {stable_mosaic.version = 11 : i64} {
  func.func @_mlp_kernel(%arg0: i32, %arg1: memref<16x896xbf16, #tpu.memory_space<vmem>>, %arg2: memref<896x128xbf16, #tpu.memory_space<vmem>>, %arg3: memref<1x128xf32, #tpu.memory_space<vmem>>, %arg4: memref<128x128xbf16, #tpu.memory_space<vmem>>, %arg5: memref<1x128xf32, #tpu.memory_space<vmem>>, %arg6: memref<16x128xf32, #tpu.memory_space<vmem>>) attributes {dimension_semantics = [#tpu.dimension_semantics<parallel>], iteration_bounds = array<i64: 1>, scalar_prefetch = 0 : i64, scratch_operands = 0 : i64, tpu.core_type = #tpu.core_type<tc>, window_params = [{transform_indices = @transform_0, window_bounds = array<i64: 16, 896>}, {pipeline_mode = #tpu.pipeline_mode<synchronous>, transform_indices = @transform_1, window_bounds = array<i64: 896, 128>}, {pipeline_mode = #tpu.pipeline_mode<synchronous>, transform_indices = @transform_2, window_bounds = array<i64: 1, 128>}, {pipeline_mode = #tpu.pipeline_mode<synchronous>, transform_indices = @transform_3, window_bounds = array<i64: 128, 128>}, {pipeline_mode = #tpu.pipeline_mode<synchronous>, transform_indices = @transform_4, window_bounds = array<i64: 1, 128>}, {transform_indices = @transform_5, window_bounds = array<i64: 16, 128>}]} {
    %c0 = arith.constant 0 : index
    %c0_0 = arith.constant 0 : index
    %0 = vector.load %arg1[%c0, %c0_0] : memref<16x896xbf16, #tpu.memory_space<vmem>>, vector<16x896xbf16>
    %c0_1 = arith.constant 0 : index
    %c0_2 = arith.constant 0 : index
    %1 = vector.load %arg2[%c0_1, %c0_2] : memref<896x128xbf16, #tpu.memory_space<vmem>>, vector<896x128xbf16>
    %cst = arith.constant dense<0.000000e+00> : vector<16x128xf32>
    %2 = tpu.matmul %0, %1, %cst {dimension_numbers = #tpu.dot_dimension_numbers<[1], [0], [0], [1], [0, 0, 1, 1], [], []>} : vector<16x896xbf16>, vector<896x128xbf16>, vector<16x128xf32> -> vector<16x128xf32>
    %c0_3 = arith.constant 0 : index
    %c0_4 = arith.constant 0 : index
    %3 = vector.load %arg3[%c0_3, %c0_4] : memref<1x128xf32, #tpu.memory_space<vmem>>, vector<1x128xf32>
    %4 = vector.broadcast %3 : vector<1x128xf32> to vector<16x128xf32>
    %5 = arith.addf %2, %4 : vector<16x128xf32>
    %cst_5 = arith.constant 0.000000e+00 : f32
    %6 = vector.broadcast %cst_5 : f32 to vector<16x128xf32>
    %7 = arith.maximumf %5, %6 : vector<16x128xf32>
    %8 = arith.truncf %7 : vector<16x128xf32> to vector<16x128xbf16>
    %c0_6 = arith.constant 0 : index
    %c0_7 = arith.constant 0 : index
    %9 = vector.load %arg4[%c0_6, %c0_7] : memref<128x128xbf16, #tpu.memory_space<vmem>>, vector<128x128xbf16>
    %cst_8 = arith.constant dense<0.000000e+00> : vector<16x128xf32>
    %10 = tpu.matmul %8, %9, %cst_8 {dimension_numbers = #tpu.dot_dimension_numbers<[1], [0], [0], [1], [0, 0, 1, 1], [], []>} : vector<16x128xbf16>, vector<128x128xbf16>, vector<16x128xf32> -> vector<16x128xf32>
    %c0_9 = arith.constant 0 : index
    %c0_10 = arith.constant 0 : index
    %11 = vector.load %arg5[%c0_9, %c0_10] : memref<1x128xf32, #tpu.memory_space<vmem>>, vector<1x128xf32>
    %12 = vector.broadcast %11 : vector<1x128xf32> to vector<16x128xf32>
    %13 = arith.addf %10, %12 : vector<16x128xf32>
    %c0_11 = arith.constant 0 : index
    %c0_12 = arith.constant 0 : index
    %14 = vector.load %arg6[%c0_11, %c0_12] : memref<16x128xf32, #tpu.memory_space<vmem>>, vector<16x128xf32>
    tpu.vector_store %arg6[%c0_11, %c0_12], %13 {strides = array<i32>} : memref<16x128xf32, #tpu.memory_space<vmem>>, vector<16x128xf32>,
    return
  }
  func.func @transform_0(%arg0: i32) -> (i32, i32) {
    %c0_i32 = arith.constant 0 : i32
    %c0_i32_0 = arith.constant 0 : i32
    return %arg0, %c0_i32 : i32, i32
  }
  func.func @transform_1(%arg0: i32) -> (i32, i32) {
    %c0_i32 = arith.constant 0 : i32
    %c0_i32_0 = arith.constant 0 : i32
    %c0_i32_1 = arith.constant 0 : i32
    return %c0_i32, %c0_i32_0 : i32, i32
  }
  func.func @transform_2(%arg0: i32) -> (i32, i32) {
    %c0_i32 = arith.constant 0 : i32
    %c0_i32_0 = arith.constant 0 : i32
    %c0_i32_1 = arith.constant 0 : i32
    return %c0_i32, %c0_i32_0 : i32, i32
  }
  func.func @transform_3(%arg0: i32) -> (i32, i32) {
    %c0_i32 = arith.constant 0 : i32
    %c0_i32_0 = arith.constant 0 : i32
    %c0_i32_1 = arith.constant 0 : i32
    return %c0_i32, %c0_i32_0 : i32, i32
  }
  func.func @transform_4(%arg0: i32) -> (i32, i32) {
    %c0_i32 = arith.constant 0 : i32
    %c0_i32_0 = arith.constant 0 : i32
    %c0_i32_1 = arith.constant 0 : i32
    return %c0_i32, %c0_i32_0 : i32, i32
  }
  func.func @transform_5(%arg0: i32) -> (i32, i32) {
    %c0_i32 = arith.constant 0 : i32
    %c0_i32_0 = arith.constant 0 : i32
    return %arg0, %c0_i32 : i32, i32
  }
}

</mosaic_0001>

<bundles_post_ra>
// kernel: tpu_custom_call.1
= control target key start
LH: loop header
LB: loop body
LE: loop exit
PB: predicated region body
PF: predicated region fallthrough
CT: control target
= control target key end

     0   :  { %10 = vsyncpa [#allocation3], 0  ;;  %s1310_s0 = inlined_call_operand.hbm [shape: bf16[16,896], index: 0, kind: input, shape index: {}]   ;;  %s1311_s1 = inlined_call_operand.hbm [shape: bf16[896,128], index: 1, kind: input, shape index: {}]   ;;  %s1312_s2 = inlined_call_operand.vmem [shape: f32[1,128], index: 2, kind: input, shape index: {}]   ;;  %s1313_s3 = inlined_call_operand.hbm [shape: bf16[128,128], index: 3, kind: input, shape index: {}]   ;;  %s1314_s4 = inlined_call_operand.vmem [shape: f32[1,128], index: 4, kind: input, shape index: {}]   ;;  %s1315_s5 = inlined_call_operand.hbm [shape: f32[16,128], index: 5, kind: output, shape index: {}]  }
   0x1   :  { %11 = vsyncpa [#allocation6], 0 }
   0x2   :  { %12 = vsyncpa [#allocation4], 0  ;;  %s1230_s18 = smov [#allocation5]  }
   0x3   :  { %s30_s19 = sshll.u32 %s1230_s18, 4  ;;  %s31_s19 = int_to_ptr.vmem [resolvable:$true] %s30_s19 }
   0x4   :  { %s1152_s20 = scalar_lea.vmem %s31_s19, 7168  ;;  %p1157_p1 = scmp.lt.s32.totalorder %s31_s19, %s31_s19 }
   0x5   :  { %p1153_p0 = scmp.ne.s32.totalorder %s31_s19, %s1152_s20  ;;  %p1158_p2 = scmp.lt.s32.totalorder %s1152_s20, %s1152_s20 }
   0x7   :  { %p1159_p3 = por %p1158_p2, %p1157_p1 }
   0x9   :  { %p1160_p4 = pnand %p1159_p3, %p1153_p0 }
   0xb   :  { %1163 = shalt.err (!%p1160_p4)
}
   0xc   :  { %s1231_s21 = smov 64   ;;  %s1232_s22 = smov 4  }
   0xd   :  { %36 = dma.hbm_to_vmem [thread:$0]  %s1311_s1, 7168, %s31_s19, [#allocation6], %s1231_s21, %s1231_s21, %s1232_s22  }
   0xe   :  { %s1233_s25 = smov [#allocation2]  }
   0xf   :  { %s18_s26 = sshll.u32 %s1233_s25, 4  ;;  %s19_s26 = int_to_ptr.vmem [resolvable:$true] %s18_s26 }
  0x10   :  { %s1172_s27 = scalar_lea.vmem %s19_s26, 896  ;;  %p1177_p6 = scmp.lt.s32.totalorder %s19_s26, %s19_s26 }
  0x11   :  { %p1173_p5 = scmp.ne.s32.totalorder %s19_s26, %s1172_s27  ;;  %p1178_p7 = scmp.lt.s32.totalorder %s1172_s27, %s1172_s27 }
  0x13   :  { %p1179_p8 = por %p1178_p7, %p1177_p6 }
  0x15   :  { %p1180_p9 = pnand %p1179_p8, %p1173_p5 }
  0x17   :  { %1183 = shalt.err (!%p1180_p9)
}
  0x18   :  { %s1234_s28 = smov 448   ;;  %s1235_s29 = smov 28  }
  0x19   :  { %24 = dma.hbm_to_vmem [thread:$0]  %s1310_s0, 896, %s19_s26, [#allocation3], %s1234_s28, %s1234_s28, %s1235_s29  }
  0x1a   :  { %s1236_s7 = smov [#allocation7]  }
  0x1b   :  { %s44_s8 = sshll.u32 %s1236_s7, 4  ;;  %s45_s8 = int_to_ptr.vmem [resolvable:$true] %s44_s8 }
  0x1c   :  { %s1192_s1 = scalar_lea.vmem %s45_s8, 1024  ;;  %p1197_p11 = scmp.lt.s32.totalorder %s45_s8, %s45_s8 }
  0x1d   :  { %p1193_p10 = scmp.ne.s32.totalorder %s45_s8, %s1192_s1  ;;  %p1198_p12 = scmp.lt.s32.totalorder %s1192_s1, %s1192_s1 }
  0x1f   :  { %p1199_p13 = por %p1198_p12, %p1197_p11 }
  0x21   :  { %p1200_p0 = pnand %p1199_p13, %p1193_p10 }
  0x23   :  { %1203 = shalt.err (!%p1200_p0)
}
  0x24   :  { %50 = dma.hbm_to_vmem [thread:$0]  %s1313_s3, 1024, %s45_s8, [#allocation6], %s1231_s21, %s1231_s21, %s1232_s22  }
  0x25   :  { %1224 = dma.done.wait [#allocation3], 896  }
  0x26   :  { %1225 = vsyncadd [#allocation3], 4294966400 }
  0x27   :  { %1226 = dma.done.wait [#allocation6], 8192  }
  0x28   :  { %1227 = vsyncadd [#allocation6], 4294959104  ;;  %v1070_v0 = vld [vmem:[#allocation5 + $0x78] sm:$0xff]   ;;  %v1074_v4 = vld [vmem:[#allocation5 + $0x70] sm:$0xff]   ;;  %v1237_v36 = vmov 0.0   ;;  %vm1238_vm0 = vmmov 0  }
  0x29   :  { %v1071_v1 = vld [vmem:[#allocation5 + $0xf8] sm:$0xff]   ;;  %934 = vmatprep.subr.bf16.mxu0 %v1070_v0  ;;  %v1075_v5 = vld [vmem:[#allocation5 + $0xf0] sm:$0xff]   ;;  %v1078_v8 = vld [vmem:[#allocation5 + $0x68] sm:$0xff]   ;;  %s1239_s12 = smov [#allocation8]  }
  0x2a   :  { %v1072_v2 = vld [vmem:[#allocation5 + $0x38] sm:$0xff]   ;;  %956 = vmatprep.subr.bf16.mxu1 %v1071_v1  ;;  %v1076_v6 = vld [vmem:[#allocation5 + $0x30] sm:$0xff]   ;;  %v1079_v9 = vld [vmem:[#allocation5 + $0xe8] sm:$0xff]   ;;  %s848_s13 = sshll.u32 %s1239_s12, 4  ;;  %s849_s13 = int_to_ptr.vmem [resolvable:$true] %s848_s13 }
  0x2b   :  { %v1073_v3 = vld [vmem:[#allocation5 + $0xb8] sm:$0xff]   ;;  %935 = vmatpush3.bf16.msra.mxu0 %v1072_v2  ;;  %v1077_v7 = vld [vmem:[#allocation5 + $0xb0] sm:$0xff]   ;;  %v1080_v10 = vld [vmem:[#allocation5 + $0x28] sm:$0xff]   ;;  %s1204_s14 = scalar_lea.vmem %s849_s13, 256  ;;  %p1209_p2 = scmp.lt.s32.totalorder %s849_s13, %s849_s13 }
  0x2c   :  { %957 = vmatpush3.bf16.msra.mxu1 %v1073_v3  ;;  %936 = vmatprep.subr.bf16.mxu0 %v1074_v4  ;;  %v1081_v11 = vld [vmem:[#allocation5 + $0xa8] sm:$0xff]   ;;  %v1082_v12 = vld [vmem:[#allocation5 + $0x60] sm:$0xff]   ;;  %v1086_v16 = vld [vmem:[#allocation5 + $0x58] sm:$0xff]   ;;  %p1205_p1 = scmp.ne.s32.totalorder %s849_s13, %s1204_s14  ;;  %p1210_p3 = scmp.lt.s32.totalorder %s1204_s14, %s1204_s14 }
  0x2d   :  { %958 = vmatprep.subr.bf16.mxu1 %v1075_v5  ;;  %v1083_v13 = vld [vmem:[#allocation5 + $0xe0] sm:$0xff]   ;;  %v1087_v17 = vld [vmem:[#allocation5 + $0xd8] sm:$0xff]   ;;  %v1090_v20 = vld [vmem:[#allocation5 + $0x50] sm:$0xff]  }
  0x2e   :  { %v1084_v14 = vld [vmem:[#allocation5 + $0x20] sm:$0xff]   ;;  %v1088_v18 = vld [vmem:[#allocation5 + $0x18] sm:$0xff]   ;;  %v1091_v21 = vld [vmem:[#allocation5 + $0xd0] sm:$0xff]   ;;  %p1211_p4 = por %p1210_p3, %p1209_p2 }
  0x2f   :  { %937 = vmatpush3.bf16.msra.mxu0 %v1076_v6  ;;  %v1085_v15 = vld [vmem:[#allocation5 + $0xa0] sm:$0xff]   ;;  %v1089_v19 = vld [vmem:[#allocation5 + $0x98] sm:$0xff]   ;;  %v1092_v22 = vld [vmem:[#allocation5 + $0x10] sm:$0xff]  }
  0x30   :  { %959 = vmatpush3.bf16.msra.mxu1 %v1077_v7  ;;  %938 = vmatprep.subr.bf16.mxu0 %v1078_v8  ;;  %v1093_v23 = vld [vmem:[#allocation5 + $0x90] sm:$0xff]   ;;  %v1094_v24 = vld [vmem:[#allocation5 + $0x48] sm:$0xff]   ;;  %v1098_v28 = vld [vmem:[#allocation5 + $0x40] sm:$0xff]   ;;  %p1212_p5 = pnand %p1211_p4, %p1205_p1 }
  0x31   :  { %960 = vmatprep.subr.bf16.mxu1 %v1079_v9  ;;  %v1095_v25 = vld [vmem:[#allocation5 + $0xc8] sm:$0xff]   ;;  %v1099_v29 = vld [vmem:[#allocation5 + $0xc0] sm:$0xff]   ;;  %v1107_v35 = vld [vmem:[#allocation2 + $0xc] ss:$28 sps:$4 sm:$0xff]  }
  0x32   :  { %v1096_v26 = vld [vmem:[#allocation5 + $0x8] sm:$0xff]   ;;  %v1100_v30 = vld [vmem:[#allocation5] sm:$0xff]   ;;  %v1108_v37 = vld [vmem:[#allocation5 + $0x178] sm:$0xff]   ;;  %635 = vmatprep.mubr.bf16.mxu1 %v1107_v35 }
  0x33   :  { %939 = vmatpush3.bf16.msra.mxu0 %v1080_v10  ;;  %v1097_v27 = vld [vmem:[#allocation5 + $0x88] sm:$0xff]   ;;  %v1101_v31 = vld [vmem:[#allocation5 + $0x80] sm:$0xff]   ;;  %v1109_v38 = vld [vmem:[#allocation5 + $0x138] sm:$0xff]  }
  0x34   :  { %961 = vmatpush3.bf16.msra.mxu1 %v1081_v11  ;;  %940 = vmatprep.subr.bf16.mxu0 %v1082_v12  ;;  %v1102_v32 = vld [vmem:[#allocation2] ss:$28 sps:$4 sm:$0xff]   ;;  %v1105_v34 = vld [vmem:[#allocation2 + $0x8] ss:$28 sps:$4 sm:$0xff]   ;;  %v1110_v39 = vld [vmem:[#allocation5 + $0x1b8] sm:$0xff]  }
  0x35   :  { %962 = vmatprep.subr.bf16.mxu1 %v1083_v13  ;;  %v1104_v33 = vld [vmem:[#allocation2 + $0x4] ss:$28 sps:$4 sm:$0xff]   ;;  %v1111_v40 = vld [vmem:[#allocation5 + $0x170] sm:$0xff]   ;;  %v1117_v46 = vld [vmem:[#allocation5 + $0x160] sm:$0xff]  }
  0x36   :  { %594 = vmatprep.mubr.bf16.mxu0 %v1104_v33  ;;  %v1112_v41 = vld [vmem:[#allocation5 + $0x130] sm:$0xff]   ;;  %v1114_v43 = vld [vmem:[#allocation5 + $0x168] sm:$0xff]   ;;  %v1118_v47 = vld [vmem:[#allocation5 + $0x120] sm:$0xff]  }
  0x37   :  { %941 = vmatpush3.bf16.msra.mxu0 %v1084_v14  ;;  %v1113_v42 = vld [vmem:[#allocation5 + $0x1b0] sm:$0xff]   ;;  %v1115_v44 = vld [vmem:[#allocation5 + $0x128] sm:$0xff]   ;;  %v1119_v48 = vld [vmem:[#allocation5 + $0x1a0] sm:$0xff]  }
  0x38   :  { %963 = vmatpush3.bf16.msra.mxu1 %v1085_v15  ;;  %942 = vmatprep.subr.bf16.mxu0 %v1086_v16  ;;  %v1116_v45 = vld [vmem:[#allocation5 + $0x1a8] sm:$0xff]   ;;  %v1120_v49 = vld [vmem:[#allocation5 + $0x158] sm:$0xff]   ;;  %v1123_v52 = vld [vmem:[#allocation5 + $0x150] sm:$0xff]  }
  0x39   :  { %964 = vmatprep.subr.bf16.mxu1 %v1087_v17  ;;  %v1121_v50 = vld [vmem:[#allocation5 + $0x118] sm:$0xff]   ;;  %v1124_v53 = vld [vmem:[#allocation5 + $0x110] sm:$0xff]   ;;  %v1126_v55 = vld [vmem:[#allocation5 + $0x148] sm:$0xff]  }
  0x3a   :  { %v1122_v51 = vld [vmem:[#allocation5 + $0x198] sm:$0xff]   ;;  %v1125_v54 = vld [vmem:[#allocation5 + $0x190] sm:$0xff]   ;;  %v1127_v56 = vld [vmem:[#allocation5 + $0x108] sm:$0xff]  }
  0x3b   :  { %943 = vmatpush3.bf16.msra.mxu0 %v1088_v18  ;;  %v1128_v57 = vld [vmem:[#allocation5 + $0x188] sm:$0xff]   ;;  %v1129_v58 = vld [vmem:[#allocation5 + $0x140] sm:$0xff]   ;;  %v1134_v59 = vld [vmem:[#allocation2 + $0x14] ss:$28 sps:$4 sm:$0xff]  }
  0x3c   :  { %965 = vmatpush3.bf16.msra.mxu1 %v1089_v19  ;;  %944 = vmatprep.subr.bf16.mxu0 %v1090_v20  ;;  %v1130_v60 = vld [vmem:[#allocation5 + $0x100] sm:$0xff]   ;;  %v1132_v62 = vld [vmem:[#allocation2 + $0x10] ss:$28 sps:$4 sm:$0xff]   ;;  %v1138_v2 = vld [vmem:[#allocation7 + $0x28] sm:$0xff]  }
  0x3d   :  { %966 = vmatprep.subr.bf16.mxu1 %v1091_v21  ;;  %v1131_v61 = vld [vmem:[#allocation5 + $0x180] sm:$0xff]   ;;  %v1136_v0 = vld [vmem:[#allocation7 + $0x38] sm:$0xff]   ;;  %v1137_v1 = vld [vmem:[#allocation7 + $0x30] sm:$0xff]  }
  0x3e   :  { %v1135_v63 = vld [vmem:[#allocation2 + $0x18] ss:$28 sps:$4 sm:$0xff]   ;;  %v1141_v5 = vld [vmem:[#allocation7 + $0x10] sm:$0xff]   ;;  %v1142_v6 = vld [vmem:[#allocation7 + $0x8] sm:$0xff]  }
  0x3f   :  { %945 = vmatpush3.bf16.msra.mxu0 %v1092_v22  ;;  %v1139_v3 = vld [vmem:[#allocation7 + $0x20] sm:$0xff]   ;;  %v1140_v4 = vld [vmem:[#allocation7 + $0x18] sm:$0xff]   ;;  %v861_v15 = vld [vmem:[%s1312_s2] ss:$0 sm:$0xff] }
  0x40   :  { %967 = vmatpush3.bf16.msra.mxu1 %v1093_v23  ;;  %946 = vmatprep.subr.bf16.mxu0 %v1094_v24  ;;  %v1143_v7 = vld [vmem:[#allocation7] sm:$0xff]  }
  0x41   :  { %968 = vmatprep.subr.bf16.mxu1 %v1095_v25 }
  0x43   :  { %947 = vmatpush3.bf16.msra.mxu0 %v1096_v26 }
  0x44   :  { %969 = vmatpush3.bf16.msra.mxu1 %v1097_v27  ;;  %948 = vmatprep.subr.bf16.mxu0 %v1098_v28 }
  0x45   :  { %970 = vmatprep.subr.bf16.mxu1 %v1099_v29 }
  0x47   :  { %949 = vmatpush3.bf16.msra.mxu0 %v1100_v30 }
  0x48   :  { %971 = vmatpush3.bf16.msra.mxu1 %v1101_v31  ;;  %978 = vmatprep.subr.bf16.mxu0 %v1108_v37 }
  0x49   :  { %1018 = vmatprep.subr.bf16.mxu1 %v1237_v36 }
  0x4a   :  { %595 = vmatmul.mubr.bf16.vlgmr.msra.gmra.mxu0 %v1102_v32 }
  0x4b   :  { %636 = vmatmul.mubr.bf16.vlgmr.msra.gmra.mxu1 %v1105_v34  ;;  %979 = vmatpush3.bf16.msra.mxu0 %v1109_v38 }
  0x4c   :  { %1034 = vmatprep.mubr.msk.bf16.mxu1 %vm1238_vm0, %v1237_v36  ;;  %1019 = vmatpush3.bf16.msra.mxu1 %v1110_v39 }
  0x4d   :  { %980 = vmatprep.subr.bf16.mxu0 %v1111_v40  ;;  %1020 = vmatprep.subr.bf16.mxu1 %v1237_v36 }
  0x4e   :  { %676 = vmatprep.mubr.bf16.mxu0 %v1134_v59 }
  0x4f   :  { %981 = vmatpush3.bf16.msra.mxu0 %v1112_v41 }
  0x50   :  { %1021 = vmatpush3.bf16.msra.mxu1 %v1113_v42  ;;  %982 = vmatprep.subr.bf16.mxu0 %v1114_v43  ;;  %v925_v42 = vld [vmem:[%s1314_s4] ss:$0 sm:$0xff] }
  0x51   :  { %1022 = vmatprep.subr.bf16.mxu1 %v1237_v36 }
  0x53   :  { %983 = vmatpush3.bf16.msra.mxu0 %v1115_v44 }
  0x54   :  { %1023 = vmatpush3.bf16.msra.mxu1 %v1116_v45  ;;  %984 = vmatprep.subr.bf16.mxu0 %v1117_v46 }
  0x55   :  { %1024 = vmatprep.subr.bf16.mxu1 %v1237_v36 }
  0x57   :  { %985 = vmatpush3.bf16.msra.mxu0 %v1118_v47 }
  0x58   :  { %1025 = vmatpush3.bf16.msra.mxu1 %v1119_v48  ;;  %986 = vmatprep.subr.bf16.mxu0 %v1120_v49 }
  0x59   :  { %1026 = vmatprep.subr.bf16.mxu1 %v1237_v36 }
  0x5b   :  { %987 = vmatpush3.bf16.msra.mxu0 %v1121_v50 }
  0x5c   :  { %1027 = vmatpush3.bf16.msra.mxu1 %v1122_v51  ;;  %988 = vmatprep.subr.bf16.mxu0 %v1123_v52 }
  0x5d   :  { %1028 = vmatprep.subr.bf16.mxu1 %v1237_v36 }
  0x5f   :  { %989 = vmatpush3.bf16.msra.mxu0 %v1124_v53 }
  0x60   :  { %1029 = vmatpush3.bf16.msra.mxu1 %v1125_v54  ;;  %990 = vmatprep.subr.bf16.mxu0 %v1126_v55 }
  0x61   :  { %1030 = vmatprep.subr.bf16.mxu1 %v1237_v36 }
  0x63   :  { %991 = vmatpush3.bf16.msra.mxu0 %v1127_v56 }
  0x64   :  { %1031 = vmatpush3.bf16.msra.mxu1 %v1128_v57  ;;  %992 = vmatprep.subr.bf16.mxu0 %v1129_v58 }
  0x65   :  { %1032 = vmatprep.subr.bf16.mxu1 %v1237_v36 }
  0x67   :  { %993 = vmatpush3.bf16.msra.mxu0 %v1130_v60 }
  0x68   :  { %1033 = vmatpush3.bf16.msra.mxu1 %v1131_v61  ;;  %1038 = vmatprep.subr.bf16.mxu0 %v1237_v36 }
  0x6a   :  { %677 = vmatmul.mubr.bf16.vlgmr.msra.gmra.mxu0 %v1132_v62 }
  0x6b   :  { %1035 = vmatmul.mubr.bf16.vlgmr.msra.gmra.mxu1 %v1135_v63  ;;  %1054 = vmatprep.mubr.msk.bf16.mxu0 %vm1238_vm0, %v1237_v36 }
  0x6c   :  { %1039 = vmatpush3.bf16.msra.mxu0 %v1136_v0 }
  0x6d   :  { %1040 = vmatprep.subr.bf16.mxu0 %v1237_v36 }
  0x70   :  { %1041 = vmatpush3.bf16.msra.mxu0 %v1137_v1 }
  0x71   :  { %1042 = vmatprep.subr.bf16.mxu0 %v1237_v36 }
  0x74   :  { %1043 = vmatpush3.bf16.msra.mxu0 %v1138_v2 }
  0x75   :  { %1044 = vmatprep.subr.bf16.mxu0 %v1237_v36 }
  0x78   :  { %1045 = vmatpush3.bf16.msra.mxu0 %v1139_v3 }
  0x79   :  { %1046 = vmatprep.subr.bf16.mxu0 %v1237_v36 }
  0x7c   :  { %1047 = vmatpush3.bf16.msra.mxu0 %v1140_v4 }
  0x7d   :  { %1048 = vmatprep.subr.bf16.mxu0 %v1237_v36 }
  0x80   :  { %1049 = vmatpush3.bf16.msra.mxu0 %v1141_v5 }
  0x81   :  { %1050 = vmatprep.subr.bf16.mxu0 %v1237_v36 }
  0x84   :  { %1051 = vmatpush3.bf16.msra.mxu0 %v1142_v6 }
  0x85   :  { %1052 = vmatprep.subr.bf16.mxu0 %v1237_v36 }
  0x88   :  { %1053 = vmatpush3.bf16.msra.mxu0 %v1143_v7 }
 0x10a   :  { %v950_v8 = vpop.f32.mrf.mxu0 }
 0x10b   :  { %v972_v9 = vpop.f32.mrf.mxu1 }
 0x10c   :  { %v951_v10 = vpop.f32.mrf.mxu0 }
 0x10d   :  { %v973_v11 = vpop.f32.mrf.mxu1  ;;  %v952_v13 = vadd.f32 %v951_v10, %v950_v8 }
 0x10e   :  { %v953_v12 = vpop.f32.mrf.mxu0  ;;  %v974_v18 = vadd.f32 %v973_v11, %v972_v9 }
 0x10f   :  { %v975_v14 = vpop.f32.mrf.mxu1  ;;  %v597_v17 = vadd.f32 %v952_v13, %v861_v15 }
 0x110   :  { %v954_v16 = vpop.f32.mrf.mxu0 }
 0x111   :  { %v955_v19 = vadd.f32 %v954_v16, %v953_v12  ;;  %v976_v20 = vpop.f32.mrf.mxu1  ;;  %v638_v24 = vadd.f32 %v974_v18, %v597_v17 }
 0x112   :  { %v977_v26 = vadd.f32 %v976_v20, %v975_v14 }
 0x113   :  { %v600_v25 = vadd.f32 %v955_v19, %v861_v15 }
 0x115   :  { %v641_v33 = vadd.f32 %v977_v26, %v600_v25 }
 0x12a   :  { %v994_v21 = vpop.f32.mrf.mxu0 }
 0x12b   :  { %v719_v22 = vpop.f32.mrf.mxu1 }
 0x12c   :  { %v995_v23 = vpop.f32.mrf.mxu0 }
 0x12d   :  { %v996_v27 = vadd.f32 %v995_v23, %v994_v21  ;;  %v1036_v28 = vpop.f32.mrf.mxu1 }
 0x12e   :  { %v997_v29 = vpop.f32.mrf.mxu0 }
 0x12f   :  { %v679_v30 = vadd.f32 %v996_v27, %v638_v24  ;;  %v722_v31 = vpop.f32.mrf.mxu1 }
 0x130   :  { %v998_v32 = vpop.f32.mrf.mxu0 }
 0x131   :  { %v999_v34 = vadd.f32 %v998_v32, %v997_v29  ;;  %v1037_v35 = vpop.f32.mrf.mxu1  ;;  %v720_v36 = vadd.f32 %v719_v22, %v679_v30 }
 0x133   :  { %v682_v37 = vadd.f32 %v999_v34, %v641_v33  ;;  %v726_v39 = vmax.f32 %v720_v36, 0.0 }
 0x135   :  { %v723_v38 = vadd.f32 %v722_v31, %v682_v37 }
 0x137   :  { %v727_v40 = vmax.f32 %v723_v38, 0.0 }
 0x139   :  { %v728_v41 = vpack.c.bf16 %v727_v40, %v726_v39 }
 0x13b   :  { %1055 = vmatmul.mubr.bf16.vlgmr.msra.gmra.mxu0 %v728_v41 }
 0x1fb   :  { %v834_v43 = vpop.f32.mrf.mxu0 }
 0x1fc   :  { %v835_v44 = vadd.f32 %v925_v42, %v834_v43 }
 0x1fd   :  { %v1056_v45 = vpop.f32.mrf.mxu0 }
 0x1fe   :  { %841 = vst [vmem:[#allocation8] sm:$0xff] %v835_v44 }
 0x1ff   :  { %v837_v46 = vpop.f32.mrf.mxu0 }
 0x200   :  { %v838_v47 = vadd.f32 %v925_v42, %v837_v46 }
 0x201   :  { %v1057_v48 = vpop.f32.mrf.mxu0 }
 0x202   :  { %842 = vst [vmem:[#allocation8 + $0x8] sm:$0xff] %v838_v47 }
 0x203   :  { %1215 = shalt.err (!%p1212_p5)
}
 0x204   :  { %s1240_s15 = smov 128   ;;  %s1241_s4 = smov 8  }
 0x205   :  { %854 = dma.vmem_to_hbm [thread:$0]  %s849_s13, 256, %s1315_s5, [#allocation4], %s1240_s15, %s1240_s15, %s1241_s4  }
 0x206   :  { %1228 = dma.done.wait [#allocation4], 256  }
 0x207   :  { %1229 = vsyncadd [#allocation4], 4294967040 }
 0x208   :  { %858 = vsyncpa [#allocation3], 1 }
 0x209   :  { %859 = vsyncpa [#allocation6], 1 }
 0x20a   :  { %860 = vsyncpa [#allocation4], 1 }

</bundles_post_ra>
